<compile_context>
chip_gen: v6e
topology: v6e:2x2x1
jax: 0.10.0
libtpu: 0.0.40
codegen_flags: <defaults>
</compile_context>

<pallas_src>
import jax
import jax.numpy as jnp
from jax.experimental import pallas as pl
from jax.experimental.pallas import tpu as pltpu


# ----------------------------------------------------------------------------
# Pallas kernel: out[b, f] = (sum_n x[b, n] * exp(a[f] * norm[n, f])) * ws[f]
# ----------------------------------------------------------------------------
def _axs_kernel(x_ref, norm_ref, aw_ref, o_ref, acc_ref):
    # x    : (tb, tn)   input tile
    # norm : (tn, tf)   precomputed ||grid - pos2d|| tile
    # aw   : (2,  tf)   row 0 = epf(ep) coefficient a, row 1 = weightf(weight)
    # o    : (tb, tf)   output tile (written once, on the last N step)
    # acc  : (tb, tf)   f32 VMEM accumulator, resident across the N grid axis
    @pl.when(pl.program_id(2) == 0)
    def _init():
        acc_ref[...] = jnp.zeros_like(acc_ref)

    a = aw_ref[0:1, :]                                   # (1, tf)
    w = jnp.exp(a * norm_ref[...])                       # (tn, tf)  EUP exp
    acc_ref[...] += jnp.dot(x_ref[...], w,
                            preferred_element_type=jnp.float32)

    @pl.when(pl.program_id(2) == pl.num_programs(2) - 1)
    def _writeback():
        ws = aw_ref[1:2, :]                              # (1, tf)
        o_ref[...] = (acc_ref[...] * ws).astype(o_ref.dtype)


# ----------------------------------------------------------------------------
# Parameter init (mirrors axs.reset_parameters() with random=False)
# ----------------------------------------------------------------------------
def make_axs_params(x_out, y_out, x_end=1.0, y_end=1.0, dtype=jnp.float32):
    x_lin = jnp.linspace(0.0, x_end, x_out, dtype=dtype)
    y_lin = jnp.linspace(0.0, y_end, y_out, dtype=dtype)
    pos_x = jnp.broadcast_to(x_lin[None, :], (y_out, x_out))
    pos_y = jnp.broadcast_to(y_lin[:, None], (y_out, x_out))
    pos2d = jnp.stack([pos_x, pos_y], axis=-1)           # (y_out, x_out, 2)
    weight = jnp.full((y_out, x_out), 0.167, dtype=dtype)
    ep = jnp.full((y_out, x_out), -0.1, dtype=dtype)
    return {"pos2d": pos2d, "weight": weight, "ep": ep}


# ----------------------------------------------------------------------------
# Wrapper
# ----------------------------------------------------------------------------
def _round_up(v, m):
    return ((v + m - 1) // m) * m


def _pick_tile(padded, candidates=(512, 256, 128)):
    for c in candidates:
        if padded % c == 0:
            return c
    return padded  # unreachable: padded is always a multiple of 128


def axs_forward(x, params, *, x_in, y_in, x_out, y_out, x_end=1.0, y_end=1.0):
    B, C = x.shape[0], x.shape[1]
    N = y_in * x_in
    F = y_out * x_out
    assert C * x.shape[2] * x.shape[3] == N, "flattened input must equal y_in*x_in"
    assert C == 1, "the PyTorch module's output reshape requires C == 1"

    x_flat = x.reshape(B, N).astype(jnp.float32)

    # ---- geometry precompute (hoisted out of the kernel) --------------------
    xg = jnp.linspace(0.0, x_end, x_in, dtype=jnp.float32)
    yg = jnp.linspace(0.0, y_end, y_in, dtype=jnp.float32)
    gx = jnp.broadcast_to(xg[None, :], (y_in, x_in)).reshape(N, 1)
    gy = jnp.broadcast_to(yg[:, None], (y_in, x_in)).reshape(N, 1)
    pos2d = params["pos2d"].astype(jnp.float32)
    px = pos2d[..., 0].reshape(1, F)
    py = pos2d[..., 1].reshape(1, F)
    dx = gx - px
    dy = gy - py
    norm = jnp.sqrt(dx * dx + dy * dy)                   # (N, F)

    # ---- per-output parameter activations (eval-mode RReLU) -----------------
    eps = jax.nn.log_sigmoid(params["ep"].astype(jnp.float32))
    a = jnp.where(eps >= 0, eps, eps * 105.0).reshape(F)      # RReLU(100,110)
    w = params["weight"].astype(jnp.float32)
    ws = jnp.where(w >= 0, w, w * 1.125).reshape(F)           # RReLU(1.1,1.15)
    aw = jnp.stack([a, ws], axis=0)                      # (2, F) packed side input

    # ---- lane/sublane-dense padding ------------------------------------------
    Bp = _round_up(B, 8)
    if Bp > 128:
        Bp = _round_up(Bp, 128)
    Np = _round_up(N, 128)
    Fp = _round_up(F, 128)
    tb = min(Bp, 128)
    tn = _pick_tile(Np)
    tf = _pick_tile(Fp)

    x_pad = jnp.pad(x_flat, ((0, Bp - B), (0, Np - N)))       # zeros: safe reduction
    norm_pad = jnp.pad(norm, ((0, Np - N), (0, Fp - F)))
    aw_pad = jnp.pad(aw, ((0, 0), (0, Fp - F)))

    grid = (Bp // tb, Fp // tf, Np // tn)

    cost = pl.CostEstimate(
        flops=2 * Bp * Np * Fp + Np * Fp,
        transcendentals=Np * Fp,
        bytes_accessed=4 * (Bp * Np + Np * Fp + 2 * Fp + Bp * Fp),
    )

    out_pad = pl.pallas_call(
        _axs_kernel,
        out_shape=jax.ShapeDtypeStruct((Bp, Fp), jnp.float32),
        grid_spec=pltpu.PrefetchScalarGridSpec(
            num_scalar_prefetch=0,
            grid=grid,
            in_specs=[
                pl.BlockSpec((tb, tn), lambda b, f, n: (b, n)),   # x
                pl.BlockSpec((tn, tf), lambda b, f, n: (n, f)),   # norm
                pl.BlockSpec((2, tf), lambda b, f, n: (0, f)),    # packed a / ws
            ],
            out_specs=pl.BlockSpec((tb, tf), lambda b, f, n: (b, f)),
            scratch_shapes=[pltpu.VMEM((tb, tf), jnp.float32)],
        ),
        compiler_params=pltpu.CompilerParams(
            dimension_semantics=("parallel", "parallel", "arbitrary"),
        ),
        cost_estimate=cost,
    )(x_pad, norm_pad, aw_pad)

    out = out_pad[:B, :F]
    return out.reshape(B, C, y_out, x_out)


# ----------------------------------------------------------------------------
# Pure-JAX reference mirroring the torch forward (eval-mode RReLU)
# ----------------------------------------------------------------------------
def _reference(x, params, *, x_in, y_in, x_out, y_out, x_end=1.0, y_end=1.0):
    B, C = x.shape[0], x.shape[1]
    N, F = y_in * x_in, y_out * x_out
    xg = jnp.linspace(0.0, x_end, x_in)
    yg = jnp.linspace(0.0, y_end, y_in)
    grid = jnp.stack(
        [jnp.broadcast_to(xg[None, :], (y_in, x_in)),
         jnp.broadcast_to(yg[:, None], (y_in, x_in))], axis=-1)      # (yi,xi,2)
    grid = grid[:, :, None, None, :] - params["pos2d"][None, None]   # (yi,xi,yo,xo,2)
    grid_norm = jnp.sqrt(jnp.sum(grid * grid, axis=-1))
    eps = jax.nn.log_sigmoid(params["ep"])
    a = jnp.where(eps >= 0, eps, eps * 105.0)
    ex = jnp.exp(a[None, None] * grid_norm)                          # (yi,xi,yo,xo)
    W = jnp.transpose(ex, (2, 3, 0, 1)).reshape(F, N)
    i2d = x.reshape(B, -1).T                                         # (N, B)
    o21 = jnp.matmul(W, i2d, precision=jax.lax.Precision.HIGHEST)    # (F, B)
    w = params["weight"]
    ws = jnp.where(w >= 0, w, w * 1.125)
    return o21.T.reshape(B, C, y_out, x_out) * ws[None, None]


if __name__ == "__main__":
    key = jax.random.PRNGKey(0)
    k1, k2 = jax.random.split(key)

    # Test 1: aligned small shapes (N=1024, F=256) -> grid (1, 1, 2).
    x_in, y_in, x_out, y_out = 32, 32, 16, 16
    B, C = 4, 1
    x = jax.random.normal(k1, (B, C, y_in, x_in), dtype=jnp.float32)
    params = make_axs_params(x_out, y_out)
    out = axs_forward(x, params, x_in=x_in, y_in=y_in, x_out=x_out, y_out=y_out)
    out = jax.block_until_ready(out)
    ref = _reference(x, params, x_in=x_in, y_in=y_in, x_out=x_out, y_out=y_out)
    assert out.shape == (B, C, y_out, x_out)
    assert jnp.allclose(out, ref, atol=1e-4, rtol=1e-5), "mismatch vs reference (test 1)"

    # Test 2: ragged shapes exercising the zero-padding path (N=120, F=35).
    x_in, y_in, x_out, y_out = 12, 10, 7, 5
    B, C = 3, 1
    x = jax.random.normal(k2, (B, C, y_in, x_in), dtype=jnp.float32)
    params = make_axs_params(x_out, y_out)
    out = axs_forward(x, params, x_in=x_in, y_in=y_in, x_out=x_out, y_out=y_out)
    out = jax.block_until_ready(out)
    ref = _reference(x, params, x_in=x_in, y_in=y_in, x_out=x_out, y_out=y_out)
    assert out.shape == (B, C, y_out, x_out)
    assert jnp.allclose(out, ref, atol=1e-4, rtol=1e-5), "mismatch vs reference (test 2)"

    # TODO(synk): nn.RReLU training-mode stochastic slope and the unused
    # nn.Hardshrink member are not reproduced (eval-mode semantics / omitted).
    print("KERNEL_OK")
</pallas_src>

<mosaic_0001>
module attributes {stable_mosaic.version = 11 : i64} {
  func.func @_axs_kernel(%arg0: i32, %arg1: i32, %arg2: i32, %arg3: memref<8x512xf32, #tpu.memory_space<vmem>>, %arg4: memref<512x256xf32, #tpu.memory_space<vmem>>, %arg5: memref<2x256xf32, #tpu.memory_space<vmem>>, %arg6: memref<8x256xf32, #tpu.memory_space<vmem>>, %arg7: memref<8x256xf32, #tpu.memory_space<vmem>>) attributes {dimension_semantics = [#tpu.dimension_semantics<parallel>, #tpu.dimension_semantics<parallel>, #tpu.dimension_semantics<arbitrary>], iteration_bounds = array<i64: 1, 1, 2>, scalar_prefetch = 0 : i64, scratch_operands = 1 : i64, tpu.core_type = #tpu.core_type<tc>, window_params = [{transform_indices = @transform_0, window_bounds = array<i64: 8, 512>}, {transform_indices = @transform_1, window_bounds = array<i64: 512, 256>}, {transform_indices = @transform_2, window_bounds = array<i64: 2, 256>}, {transform_indices = @transform_3, window_bounds = array<i64: 8, 256>}]} {
    %c0_i32 = arith.constant 0 : i32
    %0 = arith.cmpi eq, %arg2, %c0_i32 : i32
    %1 = arith.extui %0 : i1 to i32
    %c0_i32_0 = arith.constant 0 : i32
    %2 = arith.cmpi ne, %1, %c0_i32_0 : i32
    scf.if %2 {
      %cst_11 = arith.constant 0.000000e+00 : f32
      %16 = vector.broadcast %cst_11 : f32 to vector<8x256xf32>
      %c0_12 = arith.constant 0 : index
      %c0_13 = arith.constant 0 : index
      %17 = vector.load %arg7[%c0_12, %c0_13] : memref<8x256xf32, #tpu.memory_space<vmem>>, vector<8x256xf32>
      tpu.vector_store %arg7[%c0_12, %c0_13], %16 {strides = array<i32>} : memref<8x256xf32, #tpu.memory_space<vmem>>, vector<8x256xf32>,
    } else {
    }
    %c0 = arith.constant 0 : index
    %c0_1 = arith.constant 0 : index
    %3 = vector.load %arg5[%c0, %c0_1] : memref<2x256xf32, #tpu.memory_space<vmem>>, vector<1x256xf32>
    %c0_2 = arith.constant 0 : index
    %c0_3 = arith.constant 0 : index
    %4 = vector.load %arg4[%c0_2, %c0_3] : memref<512x256xf32, #tpu.memory_space<vmem>>, vector<512x256xf32>
    %5 = vector.broadcast %3 : vector<1x256xf32> to vector<512x256xf32>
    %6 = arith.mulf %5, %4 : vector<512x256xf32>
    %7 = math.exp %6 : vector<512x256xf32>
    %c0_4 = arith.constant 0 : index
    %c0_5 = arith.constant 0 : index
    %8 = vector.load %arg7[%c0_4, %c0_5] : memref<8x256xf32, #tpu.memory_space<vmem>>, vector<8x256xf32>
    %c0_6 = arith.constant 0 : index
    %c0_7 = arith.constant 0 : index
    %9 = vector.load %arg3[%c0_6, %c0_7] : memref<8x512xf32, #tpu.memory_space<vmem>>, vector<8x512xf32>
    %cst = arith.constant dense<0.000000e+00> : vector<8x256xf32>
    %10 = tpu.matmul %9, %7, %cst {dimension_numbers = #tpu.dot_dimension_numbers<[1], [0], [0], [1], [0, 0, 1, 1], [], []>} : vector<8x512xf32>, vector<512x256xf32>, vector<8x256xf32> -> vector<8x256xf32>
    %11 = arith.addf %8, %10 : vector<8x256xf32>
    %c0_8 = arith.constant 0 : index
    %c0_9 = arith.constant 0 : index
    %12 = vector.load %arg7[%c0_8, %c0_9] : memref<8x256xf32, #tpu.memory_space<vmem>>, vector<8x256xf32>
    tpu.vector_store %arg7[%c0_8, %c0_9], %11 {strides = array<i32>} : memref<8x256xf32, #tpu.memory_space<vmem>>, vector<8x256xf32>,
    %c1_i32 = arith.constant 1 : i32
    %13 = arith.cmpi eq, %arg2, %c1_i32 : i32
    %14 = arith.extui %13 : i1 to i32
    %c0_i32_10 = arith.constant 0 : i32
    %15 = arith.cmpi ne, %14, %c0_i32_10 : i32
    scf.if %15 {
      %c1 = arith.constant 1 : index
      %c0_11 = arith.constant 0 : index
      %16 = vector.load %arg5[%c1, %c0_11] : memref<2x256xf32, #tpu.memory_space<vmem>>, vector<1x256xf32>
      %c0_12 = arith.constant 0 : index
      %c0_13 = arith.constant 0 : index
      %17 = vector.load %arg7[%c0_12, %c0_13] : memref<8x256xf32, #tpu.memory_space<vmem>>, vector<8x256xf32>
      %18 = vector.broadcast %16 : vector<1x256xf32> to vector<8x256xf32>
      %19 = arith.mulf %17, %18 : vector<8x256xf32>
      %c0_14 = arith.constant 0 : index
      %c0_15 = arith.constant 0 : index
      %20 = vector.load %arg6[%c0_14, %c0_15] : memref<8x256xf32, #tpu.memory_space<vmem>>, vector<8x256xf32>
      tpu.vector_store %arg6[%c0_14, %c0_15], %19 {strides = array<i32>} : memref<8x256xf32, #tpu.memory_space<vmem>>, vector<8x256xf32>,
    } else {
    }
    return
  }
  func.func @transform_0(%arg0: i32, %arg1: i32, %arg2: i32) -> (i32, i32) {
    %c0_i32 = arith.constant 0 : i32
    return %arg0, %arg2 : i32, i32
  }
  func.func @transform_1(%arg0: i32, %arg1: i32, %arg2: i32) -> (i32, i32) {
    %c0_i32 = arith.constant 0 : i32
    return %arg2, %arg1 : i32, i32
  }
  func.func @transform_2(%arg0: i32, %arg1: i32, %arg2: i32) -> (i32, i32) {
    %c0_i32 = arith.constant 0 : i32
    %c0_i32_0 = arith.constant 0 : i32
    return %c0_i32, %arg1 : i32, i32
  }
  func.func @transform_3(%arg0: i32, %arg1: i32, %arg2: i32) -> (i32, i32) {
    %c0_i32 = arith.constant 0 : i32
    return %arg0, %arg1 : i32, i32
  }
}

</mosaic_0001>

<bundles_post_ra>
// kernel: tpu_custom_call.1
= control target key start
LH: loop header
LB: loop body
LE: loop exit
PB: predicated region body
PF: predicated region fallthrough
CT: control target
= control target key end

     0   :  { %8 = vsyncpa [#allocation4], 0  ;;  %s2108_s0 = inlined_call_operand.hbm [shape: f32[8,1024], index: 0, kind: input, shape index: {}]   ;;  %s2109_s1 = inlined_call_operand.hbm [shape: f32[1024,256], index: 1, kind: input, shape index: {}]   ;;  %s2110_s2 = inlined_call_operand.hbm [shape: f32[2,256], index: 2, kind: input, shape index: {}]   ;;  %s2111_s3 = inlined_call_operand.hbm [shape: f32[8,256], index: 3, kind: output, shape index: {}]  }
   0x1   :  { %10 = vsyncpa [#allocation4 + $0x1], 0 }
   0x2   :  { %11 = vsyncpa [#allocation7], 0 }
   0x3   :  { %13 = vsyncpa [#allocation7 + $0x1], 0 }
   0x4   :  { %14 = vsyncpa [#allocation5], 0  ;;  %s1657_s12 = smov 0   ;;  %s1659_s13 = smov 0  }
   0x5   :  { %s1661_s14 = smov 0   ;;  %s1663_s15 = smov 0  }
   0x6   :  { %s1665_s16 = smov 0   ;;  %s1667_s17 = smov 0  }
   0x7 LB: > { %s1686_s18 = sadd.s32 4294967295, %s1628_s17   ;;  %s48_s19 = sadd.s32 1, %s1616_s14  ;;  %s1628_s17 = sphi %s1667_s17, %s20_s17   ;;  %s1624_s16 = sphi %s1665_s16, %s2129_s16   ;;  %s1620_s15 = sphi %s1663_s15, %s2128_s15   ;;  %s1616_s14 = sphi %s1661_s14, %s2127_s14   ;;  %s1612_s13 = sphi %s1659_s13, %s2126_s13   ;;  %s1608_s12 = sphi %s1657_s12, %s2125_s12  }
   0x8   : > { %p55_p0 = scmp.ne.s32.totalorder %s1616_s14, %s1612_s13  ;;  %p61_p1 = scmp.ne.s32.totalorder %s1612_s13, %s1608_s12 }
   0x9   : > { %p2112_p2 = scmp.eq.s32.totalorder %s1686_s18, 0  ;;  %p1100_p3 = scmp.ge.s32.totalorder %s1628_s17, 1 }
   0xa   : > { %p154_p4 = scmp.lt.s32.totalorder %s1628_s17, 3  ;;  %s1630_s22 = smov [#allocation8]  }
   0xb   : > { %p1697_p5 = por %p2112_p2, %p61_p1  ;;  %s170_s23 = sshll.u32 %s1630_s22, 4  ;;  %s171_s23 = int_to_ptr.vmem [resolvable:$true] %s170_s23 }
   0xc   : > { %p1701_p6 = pnand %p1100_p3, %p154_p4  ;;  %p56_p8 = scmp.eq.s32.totalorder %s1628_s17, 0 }
   0xd   : > { %s2115_s20 = scalar_select %p1697_p5, 1, 0 }
   0xe   : > { %s2116_s21 = scalar_select %p1701_p6, 1, 0 }
   0xf   : > { %p1135_p7 = pneg %p1701_p6  ;;  %s32_s25 = sadd.s32 1, %s1624_s16 }
  0x10   : > { %p1715_p10 = scmp.ge.s32.totalorder %s32_s25, 2  ;;  %p1722_p11 = por %p56_p8, %p55_p0 }
  0x11   : > { %p1710_p9 = pnand %p1135_p7, %p2112_p2  ;;  %p1147_p12 = scmp.lt.s32.totalorder %s1628_s17, 2 }
  0x12   : > { %s1471_s28 = scalar_lea.vmem %s171_s23, 64  ;;  %p1479_p7 = scmp.lt.s32.totalorder %s171_s23, %s171_s23 }
  0x13   : > { %p1462_p13 = pneg %p1710_p9  ;;  %p1472_p1 = scmp.ne.s32.totalorder %s171_s23, %s1471_s28 }
  0x14   : > { %p1480_p2 = scmp.lt.s32.totalorder %s1471_s28, %s1471_s28 }
  0x15   : > { %p1474_p3 = pnand %p1472_p1, %p1462_p13 }
  0x16   : > { %p1481_p5 = por %p1480_p2, %p1479_p7 }
  0x17   : > { %p1475_p4 = pneg %p1474_p3 }
  0x19   : > { %p1482_p6 = pnand %p1481_p5, %p1475_p4 }
  0x1b   : > { %1485 = shalt.err (!%p1482_p6)
}
  0x1c   : > { %1138 = dma.hbm_to_vmem [thread:$0]  (!%p1710_p9), %s2110_s2, 64, %s171_s23, [#allocation7]  }
  0x1d   : > { %s2131_s25 = smov (%p1715_p10, %s32_s25), 0  ;;  %s1739_s4 = sand.u32 1, %s1616_s14  }
  0x1e   : > { %s1120_s5 = sshll.u32 %s1624_s16, 9  ;;  %s44_s6 = ssub.s32 %s1624_s16, %s2131_s25 }
  0x1f   : > { %p46_p0 = scmp.eq.s32.totalorder %s44_s6, 0  ;;  %s1103_s7 = sshll.u32 %s1739_s4, 5 }
  0x20   : > { %s193_s10 = scalar_lea.hbm %s2108_s0, %s1120_s5  ;;  %s185_s12 = scalar_lea.vmem [#allocation3], %s1103_s7 }
  0x21   : > { %s1751_s11 = scalar_select %p46_p0, %s1616_s14, %s48_s19  }
  0x22   : > { %s195_s22 = sshll.u32 %s185_s12, 4  ;;  %p1757_p2 = pnand %p1147_p12, %p1722_p11  ;;  %s196_s22 = int_to_ptr.vmem [resolvable:$true] %s195_s22 }
  0x23   : > { %s1106_s24 = sshll.u32 %s1739_s4, 10  ;;  %s182_s26 = scalar_lea.sflag [#allocation4], %s1739_s4 }
  0x24   : > { %p1488_p5 = pneg %p1757_p2  ;;  %s1499_s28 = scalar_lea.vmem %s196_s22, 512 }
  0x25   : > { %p1500_p6 = scmp.ne.s32.totalorder %s196_s22, %s1499_s28  ;;  %s1631_s19 = smov [#allocation3]  }
  0x26   : > { %s1504_s27 = sshll.u32 %s1631_s19, 4  ;;  %s1505_s27 = int_to_ptr.vmem [resolvable:$false] %s1504_s27 }
  0x27   : > { %p1502_p8 = pnand %p1500_p6, %p1488_p5  ;;  %s1506_s29 = scalar_lea.vmem %s1505_s27, 1024 }
  0x28   : > { %p1507_p10 = scmp.lt.s32.totalorder %s196_s22, %s1505_s27  ;;  %p1508_p11 = scmp.lt.s32.totalorder %s1506_s29, %s1499_s28 }
  0x29   : > { %p1503_p9 = pneg %p1502_p8 }
  0x2a   : > { %p1509_p12 = por %p1508_p11, %p1507_p10 }
  0x2c   : > { %p1510_p13 = pnand %p1509_p12, %p1503_p9 }
  0x2e   : > { %1513 = shalt.err (!%p1510_p13)
}
  0x2f   : > { %1142 = dma.hbm_to_vmem [thread:$0]  (!%p1757_p2), %s193_s10, 512, %s196_s22, %s182_s26  }
  0x30   : > { %s1122_s30 = sshll.u32 %s1624_s16, 14  ;;  %s206_s4 = scalar_lea.vmem [#allocation6], %s1106_s24 }
  0x31   : > { %s216_s5 = sshll.u32 %s206_s4, 4  ;;  %s202_s6 = sand.u32 1, %s1628_s17   ;;  %s217_s5 = int_to_ptr.vmem [resolvable:$true] %s216_s5 }
  0x32   : > { %s215_s9 = scalar_lea.hbm %s2109_s1, %s1122_s30  ;;  %s203_s12 = scalar_lea.sflag [#allocation7], %s202_s6 }
  0x33   : > { %s1527_s28 = scalar_lea.vmem %s217_s5, 16384  ;;  %s1632_s19 = smov [#allocation6]  }
  0x34   : > { %p1528_p1 = scmp.ne.s32.totalorder %s217_s5, %s1527_s28  ;;  %s1532_s27 = sshll.u32 %s1632_s19, 4  ;;  %s1533_s27 = int_to_ptr.vmem [resolvable:$false] %s1532_s27 }
  0x35   : > { %s1534_s10 = scalar_lea.vmem %s1533_s27, 32768  ;;  %p1535_p7 = scmp.lt.s32.totalorder %s217_s5, %s1533_s27 }
  0x36   : > { %p1530_p3 = pnand %p1528_p1, %p1488_p5  ;;  %p1536_p0 = scmp.lt.s32.totalorder %s1534_s10, %s1527_s28 }
  0x38   : > { %p1531_p4 = pneg %p1530_p3  ;;  %p1537_p6 = por %p1536_p0, %p1535_p7 }
  0x3a   : > { %p1538_p8 = pnand %p1537_p6, %p1531_p4 }
  0x3c   : > { %1541 = shalt.err (!%p1538_p8)
}
  0x3d   : > { %s1633_s22 = smov 256   ;;  %s1634_s24 = smov 16  }
  0x3e   : > { %1145 = dma.hbm_to_vmem [thread:$0]  (!%p1757_p2), %s215_s9, 16384, %s217_s5, %s203_s12, %s1633_s22, %s1633_s22, %s1634_s24  }
  0x3f   : > { %p2121_p9 = scmp.ne.s32.totalorder %s2116_s21, 0 }
  0x40   : > { %s230_s26 = sand.u32 (!%p2121_p9), 1, %s1612_s13   ;;  %p2122_p5 = scmp.ne.s32.totalorder (!%p2121_p9), %s2115_s20, 0 }
  0x41   : > { %228 = sbr.rel (%p2121_p9) target bundleno = 465 (0x1d1), region = 32  ;;  %s1111_s29 = sshll.u32 (!%p2121_p9), %s230_s26, 5 }
  0x42   : > { %s231_s30 = scalar_lea.sflag (!%p2121_p9), [#allocation4], %s230_s26  ;;  %s1783_s4 = scalar_lea.vmem (!%p2121_p9), [#allocation3], %s1111_s29 }
  0x46   : > { %1591 = dma.done.wait (%p2122_p5), %s231_s30, 512  }
  0x47   : > { %1593 = vsyncadd (%p2122_p5), %s231_s30, 4294966784  ;;  %s239_s6 = sand.u32 1, %s1686_s18   ;;  %s1112_s23 = sshll.u32 %s230_s26, 10 }
  0x48   : > { %s240_s5 = scalar_lea.sflag [#allocation7], %s239_s6  ;;  %s1790_s7 = scalar_lea.vmem [#allocation6], %s1112_s23 }
  0x49   : > { %1595 = dma.done.wait (%p2122_p5), %s240_s5, 16384  }
  0x4a   : > { %1597 = vsyncadd (%p2122_p5), %s240_s5, 4294950912  ;;  %p2123_p2 = scmp.eq.s32.totalorder %s1686_s18, 0 }
  0x4c   : > { %1599 = dma.done.wait (%p2123_p2), [#allocation7], 64   ;;  %p2124_p10 = pmov %p2123_p2 }
  0x4d   : > { %p1114_p11 = scmp.ne.s32.totalorder %s1620_s15, 0 }
  0x4e   : > { %1601 = vsyncadd (%p2124_p10), [#allocation7], 4294967232 }
  0x4f   : > { %278 = sbr.rel (%p1114_p11) target bundleno = 86 (0x56), region = 48 }
  0x54   : > { %v1635_v0 = vmov 0.0  }
  0x55   : > { %279 = vst [vmem:[#allocation2] sm:$0xff] %v1635_v0  ;;  %280 = vst [vmem:[#allocation2 + $0x8] sm:$0xff] %v1635_v0 }
  0x56 PF: > { %v411_v1 = vlaneseq  ;;  %v281_v3 = vld [vmem:[#allocation8] ss:$2 sm:$0x3]  ;;  %v313_v4 = vld [vmem:[%s1790_s7 + $0xf8] sm:$0xff]  ;;  %v312_v8 = vld [vmem:[%s1790_s7 + $0xf0] sm:$0xff]  ;;  %p1115_p12 = scmp.ne.s32.totalorder %s1620_s15, 1 }
  0x57   : > { %v377_v7 = vld [vmem:[%s1790_s7 + $0x2f8] sm:$0xff]  ;;  %v376_v9 = vld [vmem:[%s1790_s7 + $0x2f0] sm:$0xff]  ;;  %v311_v12 = vld [vmem:[%s1790_s7 + $0xe8] sm:$0xff] }
  0x58   : > { %v1801_v2 = vshrl.u32 %v411_v1, 7  ;;  %v375_v13 = vld [vmem:[%s1790_s7 + $0x2e8] sm:$0xff]  ;;  %v310_v14 = vld [vmem:[%s1790_s7 + $0xe0] sm:$0xff]  ;;  %v309_v22 = vld [vmem:[%s1790_s7 + $0xd8] sm:$0xff] }
  0x59   : > { %v374_v19 = vld [vmem:[%s1790_s7 + $0x2e0] sm:$0xff]  ;;  %v373_v23 = vld [vmem:[%s1790_s7 + $0x2d8] sm:$0xff]  ;;  %v308_v30 = vld [vmem:[%s1790_s7 + $0xd0] sm:$0xff] }
  0x5a   : > { %v413_v5 = vsub.s32 0, %v1801_v2  ;;  %v417_v6 = vsub.s32 1, %v1801_v2  ;;  %v372_v33 = vld [vmem:[%s1790_s7 + $0x2d0] sm:$0xff]  ;;  %v307_v36 = vld [vmem:[%s1790_s7 + $0xc8] sm:$0xff]  ;;  %v306_v42 = vld [vmem:[%s1790_s7 + $0xc0] sm:$0xff] }
  0x5b   : > { %v371_v39 = vld [vmem:[%s1790_s7 + $0x2c8] sm:$0xff]  ;;  %v370_v45 = vld [vmem:[%s1790_s7 + $0x2c0] sm:$0xff]  ;;  %v305_v48 = vld [vmem:[%s1790_s7 + $0xb8] sm:$0xff] }
  0x5c   : > { %v1811_v10 = vrot.slane %v281_v3, %v413_v5  ;;  %v1815_v11 = vrot.slane %v281_v3, %v417_v6  ;;  %v369_v51 = vld [vmem:[%s1790_s7 + $0x2b8] sm:$0xff]  ;;  %v304_v54 = vld [vmem:[%s1790_s7 + $0xb0] sm:$0xff]  ;;  %v303_v60 = vld [vmem:[%s1790_s7 + $0xa8] sm:$0xff] }
  0x5d   : > { %v368_v57 = vld [vmem:[%s1790_s7 + $0x2b0] sm:$0xff]  ;;  %v367_v63 = vld [vmem:[%s1790_s7 + $0x2a8] sm:$0xff]  ;;  %v302_v3 = vld [vmem:[%s1790_s7 + $0xa0] sm:$0xff] }
  0x5e   : > { %v452_v15 = vmul.f32 %v1815_v11, %v313_v4  ;;  %v516_v16 = vmul.f32 %v1815_v11, %v377_v7  ;;  %v451_v17 = vmul.f32 %v1811_v10, %v312_v8  ;;  %v515_v18 = vmul.f32 %v1811_v10, %v376_v9  ;;  %v366_v8 = vld [vmem:[%s1790_s7 + $0x2a0] sm:$0xff] }
  0x5f   : > { %v450_v20 = vmul.f32 %v1815_v11, %v311_v12  ;;  %v514_v21 = vmul.f32 %v1815_v11, %v375_v13  ;;  %v449_v27 = vmul.f32 %v1811_v10, %v310_v14  ;;  %v513_v29 = vmul.f32 %v1811_v10, %v374_v19  ;;  %v301_v14 = vld [vmem:[%s1790_s7 + $0x98] sm:$0xff] }
  0x60   : > { %v611_v24 = vmul.f32 1.442695, %v452_v15  ;;  %v739_v25 = vmul.f32 1.442695, %v516_v16  ;;  %v609_v26 = vmul.f32 1.442695, %v451_v17  ;;  %v448_v32 = vmul.f32 %v1815_v11, %v309_v22 }
  0x61   : > { %v737_v28 = vmul.f32 1.442695, %v515_v18  ;;  %v607_v31 = vmul.f32 1.442695, %v450_v20  ;;  %v735_v34 = vmul.f32 1.442695, %v514_v21  ;;  %v512_v35 = vmul.f32 %v1815_v11, %v373_v23 }
  0x62   : > { %1204 = vpow2.f32 %v611_v24  ;;  %v605_v37 = vmul.f32 1.442695, %v449_v27  ;;  %v447_v38 = vmul.f32 %v1811_v10, %v308_v30  ;;  %v733_v40 = vmul.f32 1.442695, %v513_v29  ;;  %v365_v18 = vld [vmem:[%s1790_s7 + $0x298] sm:$0xff]  ;;  %v300_v22 = vld [vmem:[%s1790_s7 + $0x90] sm:$0xff] }
  0x63   : > { %1206 = vpow2.f32 %v739_v25  ;;  %v511_v41 = vmul.f32 %v1811_v10, %v372_v33  ;;  %v603_v43 = vmul.f32 1.442695, %v448_v32  ;;  %v446_v44 = vmul.f32 %v1815_v11, %v307_v36  ;;  %v299_v30 = vld [vmem:[%s1790_s7 + $0x88] sm:$0xff] }
  0x64   : > { %1208 = vpow2.f32 %v609_v26  ;;  %v731_v46 = vmul.f32 1.442695, %v512_v35  ;;  %v510_v47 = vmul.f32 %v1815_v11, %v371_v39  ;;  %v601_v49 = vmul.f32 1.442695, %v447_v38  ;;  %v364_v26 = vld [vmem:[%s1790_s7 + $0x290] sm:$0xff]  ;;  %v298_v38 = vld [vmem:[%s1790_s7 + $0x80] sm:$0xff] }
  0x65   : > { %1210 = vpow2.f32 %v737_v28  ;;  %v445_v50 = vmul.f32 %v1811_v10, %v306_v42  ;;  %v729_v52 = vmul.f32 1.442695, %v511_v41  ;;  %v509_v53 = vmul.f32 %v1811_v10, %v370_v45  ;;  %v362_v42 = vld [vmem:[%s1790_s7 + $0x280] sm:$0xff] }
  0x66   : > { %1212 = vpow2.f32 %v607_v31  ;;  %v599_v55 = vmul.f32 1.442695, %v446_v44  ;;  %v444_v56 = vmul.f32 %v1815_v11, %v305_v48  ;;  %v727_v58 = vmul.f32 1.442695, %v510_v47 }
  0x67   : > { %1214 = vpow2.f32 %v735_v34  ;;  %v508_v59 = vmul.f32 %v1815_v11, %v369_v51  ;;  %v597_v61 = vmul.f32 1.442695, %v445_v50  ;;  %v443_v62 = vmul.f32 %v1811_v10, %v304_v54  ;;  %v363_v34 = vld [vmem:[%s1790_s7 + $0x288] sm:$0xff]  ;;  %v361_v50 = vld [vmem:[%s1790_s7 + $0x278] sm:$0xff]  ;;  %v296_v54 = vld [vmem:[%s1790_s7 + $0x70] sm:$0xff] }
  0x68   : > { %1216 = vpow2.f32 %v605_v37  ;;  %v725_v0 = vmul.f32 1.442695, %v509_v53  ;;  %v507_v1 = vmul.f32 %v1811_v10, %v368_v57  ;;  %v595_v4 = vmul.f32 1.442695, %v444_v56 }
  0x69   : > { %1218 = vpow2.f32 %v733_v40  ;;  %v442_v7 = vmul.f32 %v1815_v11, %v303_v60  ;;  %v723_v12 = vmul.f32 1.442695, %v508_v59  ;;  %v506_v13 = vmul.f32 %v1815_v11, %v367_v63 }
  0x6a   : > { %1220 = vpow2.f32 %v603_v43  ;;  %v593_v16 = vmul.f32 1.442695, %v443_v62  ;;  %v441_v17 = vmul.f32 %v1811_v10, %v302_v3  ;;  %v721_v20 = vmul.f32 1.442695, %v507_v1  ;;  %v295_v62 = vld [vmem:[%s1790_s7 + $0x68] sm:$0xff] }
  0x6b   : > { %1222 = vpow2.f32 %v731_v46  ;;  %v505_v21 = vmul.f32 %v1811_v10, %v366_v8  ;;  %v591_v24 = vmul.f32 1.442695, %v442_v7  ;;  %v440_v25 = vmul.f32 %v1815_v11, %v301_v14  ;;  %v297_v46 = vld [vmem:[%s1790_s7 + $0x78] sm:$0xff]  ;;  %v359_v3 = vld [vmem:[%s1790_s7 + $0x268] sm:$0xff] }
  0x6c   : > { %1224 = vpow2.f32 %v601_v49  ;;  %v719_v28 = vmul.f32 1.442695, %v506_v13  ;;  %v504_v29 = vmul.f32 %v1815_v11, %v365_v18  ;;  %v589_v32 = vmul.f32 1.442695, %v441_v17 }
  0x6d   : > { %1226 = vpow2.f32 %v729_v52  ;;  %v439_v33 = vmul.f32 %v1811_v10, %v300_v22  ;;  %v717_v36 = vmul.f32 1.442695, %v505_v21  ;;  %v503_v37 = vmul.f32 %v1811_v10, %v364_v26 }
  0x6e   : > { %1228 = vpow2.f32 %v599_v55  ;;  %v587_v40 = vmul.f32 1.442695, %v440_v25  ;;  %v438_v41 = vmul.f32 %v1815_v11, %v299_v30  ;;  %v715_v44 = vmul.f32 1.442695, %v504_v29 }
  0x6f   : > { %v1205_v9 = vpop.eup %1204  ;;  %1230 = vpow2.f32 %v727_v58  ;;  %v502_v45 = vmul.f32 %v1815_v11, %v363_v34  ;;  %v585_v48 = vmul.f32 1.442695, %v439_v33  ;;  %v437_v49 = vmul.f32 %v1811_v10, %v298_v38  ;;  %v360_v58 = vld [vmem:[%s1790_s7 + $0x270] sm:$0xff] }
  0x70   : > { %v1207_v15 = vpop.eup %1206  ;;  %811 = vmatprep.subr.mxu0 %v1205_v9  ;;  %1232 = vpow2.f32 %v597_v61  ;;  %v713_v52 = vmul.f32 1.442695, %v503_v37  ;;  %v501_v53 = vmul.f32 %v1811_v10, %v362_v42  ;;  %v583_v56 = vmul.f32 1.442695, %v438_v41  ;;  %v294_v9 = vld [vmem:[%s1790_s7 + $0x60] sm:$0xff] }
  0x71   : > { %v1209_v19 = vpop.eup %1208  ;;  %882 = vmatprep.subr.mxu1 %v1207_v15  ;;  %1234 = vpow2.f32 %v725_v0  ;;  %v436_v57 = vmul.f32 %v1815_v11, %v297_v46  ;;  %v711_v60 = vmul.f32 1.442695, %v502_v45  ;;  %v500_v61 = vmul.f32 %v1815_v11, %v361_v50  ;;  %v358_v15 = vld [vmem:[%s1790_s7 + $0x260] sm:$0xff] }
  0x72   : > { %v1211_v23 = vpop.eup %1210  ;;  %812 = vmatpush1.msra.mxu0 %v1209_v19  ;;  %1236 = vpow2.f32 %v595_v4  ;;  %v581_v0 = vmul.f32 1.442695, %v437_v49  ;;  %v435_v1 = vmul.f32 %v1811_v10, %v296_v54  ;;  %v709_v7 = vmul.f32 1.442695, %v501_v53  ;;  %v293_v19 = vld [vmem:[%s1790_s7 + $0x58] sm:$0xff] }
  0x73   : > { %v1213_v27 = vpop.eup %1212  ;;  %883 = vmatpush1.msra.mxu1 %v1211_v23  ;;  %1238 = vpow2.f32 %v723_v12  ;;  %v499_v8 = vmul.f32 %v1811_v10, %v360_v58  ;;  %v579_v13 = vmul.f32 1.442695, %v436_v57  ;;  %v434_v14 = vmul.f32 %v1815_v11, %v295_v62  ;;  %v357_v23 = vld [vmem:[%s1790_s7 + $0x258] sm:$0xff] }
  0x74   : > { %v1215_v31 = vpop.eup %1214  ;;  %813 = vmatprep.subr.mxu0 %v1213_v27  ;;  %1240 = vpow2.f32 %v593_v16  ;;  %v707_v17 = vmul.f32 1.442695, %v500_v61  ;;  %v498_v18 = vmul.f32 %v1815_v11, %v359_v3  ;;  %v577_v21 = vmul.f32 1.442695, %v435_v1  ;;  %v292_v27 = vld [vmem:[%s1790_s7 + $0x50] sm:$0xff] }
  0x75   : > { %v1217_v35 = vpop.eup %1216  ;;  %884 = vmatprep.subr.mxu1 %v1215_v31  ;;  %1242 = vpow2.f32 %v721_v20  ;;  %v433_v22 = vmul.f32 %v1811_v10, %v294_v9  ;;  %v705_v25 = vmul.f32 1.442695, %v499_v8  ;;  %v497_v26 = vmul.f32 %v1811_v10, %v358_v15  ;;  %v356_v31 = vld [vmem:[%s1790_s7 + $0x250] sm:$0xff] }
  0x76   : > { %v1219_v39 = vpop.eup %1218  ;;  %814 = vmatpush1.msra.mxu0 %v1217_v35  ;;  %1244 = vpow2.f32 %v591_v24  ;;  %v575_v29 = vmul.f32 1.442695, %v434_v14  ;;  %v432_v30 = vmul.f32 %v1815_v11, %v293_v19  ;;  %v703_v33 = vmul.f32 1.442695, %v498_v18  ;;  %v291_v35 = vld [vmem:[%s1790_s7 + $0x48] sm:$0xff] }
  0x77   : > { %v1221_v43 = vpop.eup %1220  ;;  %885 = vmatpush1.msra.mxu1 %v1219_v39  ;;  %1246 = vpow2.f32 %v719_v28  ;;  %v496_v34 = vmul.f32 %v1815_v11, %v357_v23  ;;  %v573_v37 = vmul.f32 1.442695, %v433_v22  ;;  %v431_v38 = vmul.f32 %v1811_v10, %v292_v27  ;;  %v355_v39 = vld [vmem:[%s1790_s7 + $0x248] sm:$0xff] }
  0x78   : > { %v1223_v47 = vpop.eup %1222  ;;  %815 = vmatprep.subr.mxu0 %v1221_v43  ;;  %1248 = vpow2.f32 %v589_v32  ;;  %v701_v41 = vmul.f32 1.442695, %v497_v26  ;;  %v495_v42 = vmul.f32 %v1811_v10, %v356_v31  ;;  %v290_v43 = vld [vmem:[%s1790_s7 + $0x40] sm:$0xff]  ;;  %v571_v45 = vmul.f32 1.442695, %v432_v30 }
  0x79   : > { %v1225_v51 = vpop.eup %1224  ;;  %886 = vmatprep.subr.mxu1 %v1223_v47  ;;  %1250 = vpow2.f32 %v717_v36  ;;  %v430_v46 = vmul.f32 %v1815_v11, %v291_v35  ;;  %v354_v47 = vld [vmem:[%s1790_s7 + $0x240] sm:$0xff]  ;;  %v699_v49 = vmul.f32 1.442695, %v496_v34  ;;  %v494_v50 = vmul.f32 %v1815_v11, %v355_v39 }
  0x7a   : > { %v1227_v55 = vpop.eup %1226  ;;  %816 = vmatpush1.msra.mxu0 %v1225_v51  ;;  %1252 = vpow2.f32 %v587_v40  ;;  %v289_v51 = vld [vmem:[%s1790_s7 + $0x38] sm:$0xff]  ;;  %v569_v53 = vmul.f32 1.442695, %v431_v38  ;;  %v429_v54 = vmul.f32 %v1811_v10, %v290_v43  ;;  %v697_v57 = vmul.f32 1.442695, %v495_v42 }
  0x7b   : > { %v1229_v59 = vpop.eup %1228  ;;  %887 = vmatpush1.msra.mxu1 %v1227_v55  ;;  %1254 = vpow2.f32 %v715_v44  ;;  %v353_v55 = vld [vmem:[%s1790_s7 + $0x238] sm:$0xff]  ;;  %v493_v58 = vmul.f32 %v1811_v10, %v354_v47  ;;  %v567_v61 = vmul.f32 1.442695, %v430_v46  ;;  %v428_v62 = vmul.f32 %v1815_v11, %v289_v51 }
  0x7c   : > { %v1231_v63 = vpop.eup %1230  ;;  %817 = vmatprep.subr.mxu0 %v1229_v59  ;;  %1256 = vpow2.f32 %v585_v48  ;;  %v288_v59 = vld [vmem:[%s1790_s7 + $0x30] sm:$0xff]  ;;  %v695_v1 = vmul.f32 1.442695, %v494_v50  ;;  %v492_v3 = vmul.f32 %v1815_v11, %v353_v55  ;;  %v565_v8 = vmul.f32 1.442695, %v429_v54  ;;  %v810_v46 = vld [vmem:[%s1783_s4 + $0x18] sm:$0xff] }
  0x7d   : > { %v1233_v4 = vpop.eup %1232  ;;  %888 = vmatprep.subr.mxu1 %v1231_v63  ;;  %1258 = vpow2.f32 %v713_v52  ;;  %v352_v63 = vld [vmem:[%s1790_s7 + $0x230] sm:$0xff]  ;;  %v427_v9 = vmul.f32 %v1811_v10, %v288_v59  ;;  %v693_v14 = vmul.f32 1.442695, %v493_v58  ;;  %v563_v18 = vmul.f32 1.442695, %v428_v62  ;;  %v282_v50 = vld [vmem:[%s1790_s7] sm:$0xff]  ;;  %946 = vmatprep.mubr.f32.mxu1 %v810_v46 }
  0x7e   : > { %v1235_v12 = vpop.eup %1234  ;;  %818 = vmatpush1.msra.mxu0 %v1233_v4  ;;  %1260 = vpow2.f32 %v583_v56  ;;  %v287_v4 = vld [vmem:[%s1790_s7 + $0x28] sm:$0xff]  ;;  %v491_v15 = vmul.f32 %v1811_v10, %v352_v63  ;;  %v691_v22 = vmul.f32 1.442695, %v492_v3  ;;  %v346_v54 = vld [vmem:[%s1790_s7 + $0x200] sm:$0xff]  ;;  %v345_v58 = vld [vmem:[%s1790_s7 + $0x1f8] sm:$0xff] }
  0x7f   : > { %v1237_v16 = vpop.eup %1236  ;;  %889 = vmatpush1.msra.mxu1 %v1235_v12  ;;  %1262 = vpow2.f32 %v711_v60  ;;  %v351_v12 = vld [vmem:[%s1790_s7 + $0x228] sm:$0xff]  ;;  %v426_v19 = vmul.f32 %v1815_v11, %v287_v4  ;;  %v561_v26 = vmul.f32 1.442695, %v427_v9  ;;  %v409_v62 = vld [vmem:[%s1790_s7 + $0x3f8] sm:$0xff]  ;;  %v344_v3 = vld [vmem:[%s1790_s7 + $0x1f0] sm:$0xff] }
  0x80   : > { %v1239_v20 = vpop.eup %1238  ;;  %819 = vmatprep.subr.mxu0 %v1237_v16  ;;  %1264 = vpow2.f32 %v581_v0  ;;  %v286_v16 = vld [vmem:[%s1790_s7 + $0x20] sm:$0xff]  ;;  %v490_v23 = vmul.f32 %v1815_v11, %v351_v12  ;;  %v689_v30 = vmul.f32 1.442695, %v491_v15  ;;  %v408_v9 = vld [vmem:[%s1790_s7 + $0x3f0] sm:$0xff]  ;;  %v343_v15 = vld [vmem:[%s1790_s7 + $0x1e8] sm:$0xff] }
  0x81   : > { %v1241_v24 = vpop.eup %1240  ;;  %890 = vmatprep.subr.mxu1 %v1239_v20  ;;  %1266 = vpow2.f32 %v709_v7  ;;  %v350_v20 = vld [vmem:[%s1790_s7 + $0x220] sm:$0xff]  ;;  %v425_v27 = vmul.f32 %v1811_v10, %v286_v16  ;;  %v559_v34 = vmul.f32 1.442695, %v426_v19  ;;  %v407_v19 = vld [vmem:[%s1790_s7 + $0x3e8] sm:$0xff] }
  0x82   : > { %v1243_v28 = vpop.eup %1242  ;;  %820 = vmatpush1.msra.mxu0 %v1241_v24  ;;  %1268 = vpow2.f32 %v579_v13  ;;  %v285_v24 = vld [vmem:[%s1790_s7 + $0x18] sm:$0xff]  ;;  %v489_v31 = vmul.f32 %v1811_v10, %v350_v20  ;;  %v687_v38 = vmul.f32 1.442695, %v490_v23  ;;  %v342_v23 = vld [vmem:[%s1790_s7 + $0x1e0] sm:$0xff] }
  0x83   : > { %v1245_v32 = vpop.eup %1244  ;;  %891 = vmatpush1.msra.mxu1 %v1243_v28  ;;  %1270 = vpow2.f32 %v707_v17  ;;  %v349_v28 = vld [vmem:[%s1790_s7 + $0x218] sm:$0xff]  ;;  %v424_v35 = vmul.f32 %v1815_v11, %v285_v24  ;;  %v557_v43 = vmul.f32 1.442695, %v425_v27  ;;  %v406_v27 = vld [vmem:[%s1790_s7 + $0x3e0] sm:$0xff] }
  0x84   : > { %v1247_v36 = vpop.eup %1246  ;;  %821 = vmatprep.subr.mxu0 %v1245_v32  ;;  %1272 = vpow2.f32 %v577_v21  ;;  %v284_v32 = vld [vmem:[%s1790_s7 + $0x10] sm:$0xff]  ;;  %v488_v39 = vmul.f32 %v1815_v11, %v349_v28 }
  0x85   : > { %v1249_v40 = vpop.eup %1248  ;;  %892 = vmatprep.subr.mxu1 %v1247_v36  ;;  %1274 = vpow2.f32 %v705_v25  ;;  %v348_v36 = vld [vmem:[%s1790_s7 + $0x210] sm:$0xff] }
  0x86   : > { %v1251_v44 = vpop.eup %1250  ;;  %822 = vmatpush1.msra.mxu0 %v1249_v40  ;;  %1276 = vpow2.f32 %v575_v29  ;;  %v283_v40 = vld [vmem:[%s1790_s7 + $0x8] sm:$0xff] }
  0x87   : > { %v1253_v48 = vpop.eup %1252  ;;  %893 = vmatpush1.msra.mxu1 %v1251_v44  ;;  %1278 = vpow2.f32 %v703_v33  ;;  %v423_v44 = vmul.f32 %v1811_v10, %v284_v32 }
  0x88   : > { %v1255_v52 = vpop.eup %1254  ;;  %823 = vmatprep.subr.mxu0 %v1253_v48  ;;  %1280 = vpow2.f32 %v573_v37  ;;  %v685_v48 = vmul.f32 1.442695, %v489_v31  ;;  %v341_v31 = vld [vmem:[%s1790_s7 + $0x1d8] sm:$0xff] }
  0x89   : > { %v1257_v56 = vpop.eup %1256  ;;  %894 = vmatprep.subr.mxu1 %v1255_v52  ;;  %1282 = vpow2.f32 %v701_v41  ;;  %v808_v41 = vld [vmem:[%s1783_s4 + $0x8] sm:$0xff]  ;;  %v555_v52 = vmul.f32 1.442695, %v424_v35  ;;  %v405_v35 = vld [vmem:[%s1790_s7 + $0x3d8] sm:$0xff] }
  0x8a   : > { %v1259_v60 = vpop.eup %1258  ;;  %824 = vmatpush1.msra.mxu0 %v1257_v56  ;;  %1284 = vpow2.f32 %v571_v45  ;;  %v347_v45 = vld [vmem:[%s1790_s7 + $0x208] sm:$0xff]  ;;  %875 = vmatprep.mubr.f32.mxu0 %v808_v41  ;;  %v683_v56 = vmul.f32 1.442695, %v488_v39  ;;  %v340_v39 = vld [vmem:[%s1790_s7 + $0x1d0] sm:$0xff]  ;;  %v544_v46 = vmul.f32 %v1815_v11, %v405_v35 }
  0x8b   : > { %v1261_v0 = vpop.eup %1260  ;;  %895 = vmatpush1.msra.mxu1 %v1259_v60  ;;  %1286 = vpow2.f32 %v699_v49  ;;  %v487_v49 = vmul.f32 %v1811_v10, %v348_v36  ;;  %v553_v60 = vmul.f32 1.442695, %v423_v44 }
  0x8c   : > { %v1263_v7 = vpop.eup %1262  ;;  %825 = vmatprep.subr.mxu0 %v1261_v0  ;;  %1288 = vpow2.f32 %v569_v53  ;;  %v422_v53 = vmul.f32 %v1815_v11, %v283_v40 }
  0x8d   : > { %v1265_v13 = vpop.eup %1264  ;;  %896 = vmatprep.subr.mxu1 %v1263_v7  ;;  %1290 = vpow2.f32 %v697_v57  ;;  %v486_v57 = vmul.f32 %v1815_v11, %v347_v45  ;;  %v681_v0 = vmul.f32 1.442695, %v487_v49 }
  0x8e   : > { %v1267_v17 = vpop.eup %1266  ;;  %826 = vmatpush1.msra.mxu0 %v1265_v13  ;;  %1292 = vpow2.f32 %v567_v61  ;;  %v421_v61 = vmul.f32 %v1811_v10, %v282_v50  ;;  %v551_v7 = vmul.f32 1.442695, %v422_v53  ;;  %v479_v50 = vmul.f32 %v1811_v10, %v340_v39 }
  0x8f   : > { %v1269_v21 = vpop.eup %1268  ;;  %897 = vmatpush1.msra.mxu1 %v1267_v17  ;;  %1294 = vpow2.f32 %v695_v1  ;;  %v485_v1 = vmul.f32 %v1811_v10, %v346_v54  ;;  %v679_v13 = vmul.f32 1.442695, %v486_v57 }
  0x90   : > { %v1271_v25 = vpop.eup %1270  ;;  %827 = vmatprep.subr.mxu0 %v1269_v21  ;;  %1296 = vpow2.f32 %v565_v8  ;;  %v484_v8 = vmul.f32 %v1815_v11, %v345_v58  ;;  %v549_v17 = vmul.f32 1.442695, %v421_v61  ;;  %v795_v61 = vmul.f32 1.442695, %v544_v46 }
  0x91   : > { %v1273_v29 = vpop.eup %1272  ;;  %898 = vmatprep.subr.mxu1 %v1271_v25  ;;  %1298 = vpow2.f32 %v693_v14  ;;  %v548_v14 = vmul.f32 %v1815_v11, %v409_v62  ;;  %v677_v21 = vmul.f32 1.442695, %v485_v1  ;;  %v665_v1 = vmul.f32 1.442695, %v479_v50 }
  0x92   : > { %v1275_v33 = vpop.eup %1274  ;;  %828 = vmatpush1.msra.mxu0 %v1273_v29  ;;  %1300 = vpow2.f32 %v563_v18  ;;  %v483_v18 = vmul.f32 %v1811_v10, %v344_v3  ;;  %v675_v25 = vmul.f32 1.442695, %v484_v8 }
  0x93   : > { %v1277_v37 = vpop.eup %1276  ;;  %899 = vmatpush1.msra.mxu1 %v1275_v33  ;;  %1302 = vpow2.f32 %v691_v22  ;;  %v547_v22 = vmul.f32 %v1811_v10, %v408_v9  ;;  %v803_v29 = vmul.f32 1.442695, %v548_v14 }
  0x94   : > { %v1279_v42 = vpop.eup %1278  ;;  %829 = vmatprep.subr.mxu0 %v1277_v37  ;;  %1304 = vpow2.f32 %v561_v26  ;;  %v482_v26 = vmul.f32 %v1815_v11, %v343_v15  ;;  %v673_v33 = vmul.f32 1.442695, %v483_v18 }
  0x95   : > { %v1281_v47 = vpop.eup %1280  ;;  %900 = vmatprep.subr.mxu1 %v1279_v42  ;;  %1306 = vpow2.f32 %v689_v30  ;;  %v546_v30 = vmul.f32 %v1815_v11, %v407_v19  ;;  %v801_v37 = vmul.f32 1.442695, %v547_v22  ;;  %v480_v42 = vmul.f32 %v1815_v11, %v341_v31 }
  0x96   : > { %v1283_v51 = vpop.eup %1282  ;;  %830 = vmatpush1.msra.mxu0 %v1281_v47  ;;  %1308 = vpow2.f32 %v559_v34  ;;  %v481_v34 = vmul.f32 %v1811_v10, %v342_v23  ;;  %v671_v41 = vmul.f32 1.442695, %v482_v26  ;;  %v339_v47 = vld [vmem:[%s1790_s7 + $0x1c8] sm:$0xff] }
  0x97   : > { %v1285_v55 = vpop.eup %1284  ;;  %901 = vmatpush1.msra.mxu1 %v1283_v51  ;;  %1310 = vpow2.f32 %v687_v38  ;;  %v545_v38 = vmul.f32 %v1811_v10, %v406_v27  ;;  %v799_v45 = vmul.f32 1.442695, %v546_v30  ;;  %v403_v51 = vld [vmem:[%s1790_s7 + $0x3c8] sm:$0xff]  ;;  %v667_v57 = vmul.f32 1.442695, %v480_v42 }
  0x98   : > { %v1287_v59 = vpop.eup %1286  ;;  %831 = vmatprep.subr.mxu0 %v1285_v55  ;;  %1312 = vpow2.f32 %v557_v43  ;;  %v404_v43 = vld [vmem:[%s1790_s7 + $0x3d0] sm:$0xff]  ;;  %v669_v49 = vmul.f32 1.442695, %v481_v34  ;;  %v338_v55 = vld [vmem:[%s1790_s7 + $0x1c0] sm:$0xff]  ;;  %v478_v58 = vmul.f32 %v1815_v11, %v339_v47  ;;  %v542_v62 = vmul.f32 %v1815_v11, %v403_v51 }
  0x99   : > { %v1289_v63 = vpop.eup %1288  ;;  %902 = vmatprep.subr.mxu1 %v1287_v59  ;;  %1314 = vpow2.f32 %v685_v48  ;;  %v797_v53 = vmul.f32 1.442695, %v545_v38  ;;  %v543_v54 = vmul.f32 %v1811_v10, %v404_v43  ;;  %v402_v59 = vld [vmem:[%s1790_s7 + $0x3c0] sm:$0xff]  ;;  %v477_v3 = vmul.f32 %v1811_v10, %v338_v55 }
  0x9a   : > { %v1291_v4 = vpop.eup %1290  ;;  %832 = vmatpush1.msra.mxu0 %v1289_v63  ;;  %1316 = vpow2.f32 %v555_v52  ;;  %v337_v63 = vld [vmem:[%s1790_s7 + $0x1b8] sm:$0xff]  ;;  %v541_v9 = vmul.f32 %v1811_v10, %v402_v59  ;;  %v663_v14 = vmul.f32 1.442695, %v478_v58  ;;  %v791_v18 = vmul.f32 1.442695, %v542_v62 }
  0x9b   : > { %v1293_v12 = vpop.eup %1292  ;;  %903 = vmatpush1.msra.mxu1 %v1291_v4  ;;  %1318 = vpow2.f32 %v683_v56  ;;  %v401_v4 = vld [vmem:[%s1790_s7 + $0x3b8] sm:$0xff]  ;;  %v793_v8 = vmul.f32 1.442695, %v543_v54  ;;  %v476_v15 = vmul.f32 %v1815_v11, %v337_v63  ;;  %v661_v22 = vmul.f32 1.442695, %v477_v3 }
  0x9c   : > { %v1295_v16 = vpop.eup %1294  ;;  %833 = vmatprep.subr.mxu0 %v1293_v12  ;;  %1320 = vpow2.f32 %v553_v60  ;;  %v336_v12 = vld [vmem:[%s1790_s7 + $0x1b0] sm:$0xff]  ;;  %v540_v19 = vmul.f32 %v1815_v11, %v401_v4  ;;  %v789_v26 = vmul.f32 1.442695, %v541_v9 }
  0x9d   : > { %v1297_v20 = vpop.eup %1296  ;;  %904 = vmatprep.subr.mxu1 %v1295_v16  ;;  %1322 = vpow2.f32 %v681_v0  ;;  %v400_v16 = vld [vmem:[%s1790_s7 + $0x3b0] sm:$0xff]  ;;  %v475_v23 = vmul.f32 %v1811_v10, %v336_v12  ;;  %v659_v30 = vmul.f32 1.442695, %v476_v15 }
  0x9e   : > { %v1299_v24 = vpop.eup %1298  ;;  %834 = vmatpush1.msra.mxu0 %v1297_v20  ;;  %1324 = vpow2.f32 %v551_v7  ;;  %v335_v20 = vld [vmem:[%s1790_s7 + $0x1a8] sm:$0xff]  ;;  %v539_v27 = vmul.f32 %v1811_v10, %v400_v16  ;;  %v787_v34 = vmul.f32 1.442695, %v540_v19 }
  0x9f   : > { %v1301_v28 = vpop.eup %1300  ;;  %905 = vmatpush1.msra.mxu1 %v1299_v24  ;;  %1326 = vpow2.f32 %v679_v13  ;;  %v399_v24 = vld [vmem:[%s1790_s7 + $0x3a8] sm:$0xff]  ;;  %v474_v31 = vmul.f32 %v1815_v11, %v335_v20  ;;  %v657_v38 = vmul.f32 1.442695, %v475_v23 }
  0xa0   : > { %v1303_v32 = vpop.eup %1302  ;;  %835 = vmatprep.subr.mxu0 %v1301_v28  ;;  %1328 = vpow2.f32 %v549_v17  ;;  %v334_v28 = vld [vmem:[%s1790_s7 + $0x1a0] sm:$0xff]  ;;  %v538_v35 = vmul.f32 %v1815_v11, %v399_v24  ;;  %v785_v42 = vmul.f32 1.442695, %v539_v27 }
  0xa1   : > { %v1305_v36 = vpop.eup %1304  ;;  %906 = vmatprep.subr.mxu1 %v1303_v32  ;;  %1330 = vpow2.f32 %v677_v21  ;;  %v398_v32 = vld [vmem:[%s1790_s7 + $0x3a0] sm:$0xff]  ;;  %v473_v39 = vmul.f32 %v1811_v10, %v334_v28  ;;  %v655_v46 = vmul.f32 1.442695, %v474_v31 }
  0xa2   : > { %v1307_v40 = vpop.eup %1306  ;;  %836 = vmatpush1.msra.mxu0 %v1305_v36  ;;  %1332 = vpow2.f32 %v675_v25  ;;  %v333_v36 = vld [vmem:[%s1790_s7 + $0x198] sm:$0xff]  ;;  %v537_v43 = vmul.f32 %v1811_v10, %v398_v32  ;;  %v783_v50 = vmul.f32 1.442695, %v538_v35 }
  0xa3   : > { %v1309_v44 = vpop.eup %1308  ;;  %907 = vmatpush1.msra.mxu1 %v1307_v40  ;;  %1334 = vpow2.f32 %v803_v29  ;;  %v397_v40 = vld [vmem:[%s1790_s7 + $0x398] sm:$0xff]  ;;  %v472_v47 = vmul.f32 %v1815_v11, %v333_v36  ;;  %v653_v54 = vmul.f32 1.442695, %v473_v39 }
  0xa4   : > { %v1311_v48 = vpop.eup %1310  ;;  %837 = vmatprep.subr.mxu0 %v1309_v44  ;;  %1336 = vpow2.f32 %v673_v33  ;;  %v332_v44 = vld [vmem:[%s1790_s7 + $0x190] sm:$0xff]  ;;  %v536_v51 = vmul.f32 %v1815_v11, %v397_v40  ;;  %v781_v58 = vmul.f32 1.442695, %v537_v43 }
  0xa5   : > { %v1313_v52 = vpop.eup %1312  ;;  %908 = vmatprep.subr.mxu1 %v1311_v48  ;;  %1338 = vpow2.f32 %v801_v37  ;;  %v396_v48 = vld [vmem:[%s1790_s7 + $0x390] sm:$0xff]  ;;  %v471_v55 = vmul.f32 %v1811_v10, %v332_v44  ;;  %v651_v62 = vmul.f32 1.442695, %v472_v47 }
  0xa6   : > { %v1315_v56 = vpop.eup %1314  ;;  %838 = vmatpush1.msra.mxu0 %v1313_v52  ;;  %1340 = vpow2.f32 %v671_v41  ;;  %v331_v52 = vld [vmem:[%s1790_s7 + $0x188] sm:$0xff]  ;;  %v535_v59 = vmul.f32 %v1811_v10, %v396_v48  ;;  %v779_v3 = vmul.f32 1.442695, %v536_v51 }
  0xa7   : > { %v1317_v60 = vpop.eup %1316  ;;  %909 = vmatpush1.msra.mxu1 %v1315_v56  ;;  %1342 = vpow2.f32 %v799_v45  ;;  %v395_v56 = vld [vmem:[%s1790_s7 + $0x388] sm:$0xff]  ;;  %v470_v63 = vmul.f32 %v1815_v11, %v331_v52  ;;  %v649_v9 = vmul.f32 1.442695, %v471_v55 }
  0xa8   : > { %v1319_v0 = vpop.eup %1318  ;;  %839 = vmatprep.subr.mxu0 %v1317_v60  ;;  %1344 = vpow2.f32 %v669_v49  ;;  %v330_v60 = vld [vmem:[%s1790_s7 + $0x180] sm:$0xff]  ;;  %v534_v4 = vmul.f32 %v1815_v11, %v395_v56  ;;  %v777_v15 = vmul.f32 1.442695, %v535_v59 }
  0xa9   : > { %v1321_v7 = vpop.eup %1320  ;;  %910 = vmatprep.subr.mxu1 %v1319_v0  ;;  %1346 = vpow2.f32 %v797_v53  ;;  %v394_v0 = vld [vmem:[%s1790_s7 + $0x380] sm:$0xff]  ;;  %v469_v12 = vmul.f32 %v1811_v10, %v330_v60  ;;  %v647_v19 = vmul.f32 1.442695, %v470_v63 }
  0xaa   : > { %v1323_v13 = vpop.eup %1322  ;;  %840 = vmatpush1.msra.mxu0 %v1321_v7  ;;  %1348 = vpow2.f32 %v667_v57  ;;  %v329_v7 = vld [vmem:[%s1790_s7 + $0x178] sm:$0xff]  ;;  %v533_v16 = vmul.f32 %v1811_v10, %v394_v0  ;;  %v775_v23 = vmul.f32 1.442695, %v534_v4 }
  0xab   : > { %v1325_v17 = vpop.eup %1324  ;;  %911 = vmatpush1.msra.mxu1 %v1323_v13  ;;  %1350 = vpow2.f32 %v795_v61  ;;  %v393_v13 = vld [vmem:[%s1790_s7 + $0x378] sm:$0xff]  ;;  %v468_v20 = vmul.f32 %v1815_v11, %v329_v7  ;;  %v645_v27 = vmul.f32 1.442695, %v469_v12 }
  0xac   : > { %v1327_v21 = vpop.eup %1326  ;;  %841 = vmatprep.subr.mxu0 %v1325_v17  ;;  %1352 = vpow2.f32 %v665_v1  ;;  %v328_v17 = vld [vmem:[%s1790_s7 + $0x170] sm:$0xff]  ;;  %v532_v24 = vmul.f32 %v1815_v11, %v393_v13  ;;  %v773_v31 = vmul.f32 1.442695, %v533_v16 }
  0xad   : > { %v1329_v25 = vpop.eup %1328  ;;  %912 = vmatprep.subr.mxu1 %v1327_v21  ;;  %1354 = vpow2.f32 %v793_v8  ;;  %v392_v21 = vld [vmem:[%s1790_s7 + $0x370] sm:$0xff]  ;;  %v467_v28 = vmul.f32 %v1811_v10, %v328_v17  ;;  %v643_v35 = vmul.f32 1.442695, %v468_v20 }
  0xae   : > { %v1331_v29 = vpop.eup %1330  ;;  %842 = vmatpush1.msra.mxu0 %v1329_v25  ;;  %1356 = vpow2.f32 %v663_v14  ;;  %v327_v25 = vld [vmem:[%s1790_s7 + $0x168] sm:$0xff]  ;;  %v531_v32 = vmul.f32 %v1811_v10, %v392_v21  ;;  %v771_v39 = vmul.f32 1.442695, %v532_v24 }
  0xaf   : > { %v1333_v33 = vpop.eup %1332  ;;  %913 = vmatpush1.msra.mxu1 %v1331_v29  ;;  %1358 = vpow2.f32 %v791_v18  ;;  %v391_v29 = vld [vmem:[%s1790_s7 + $0x368] sm:$0xff]  ;;  %v466_v36 = vmul.f32 %v1815_v11, %v327_v25  ;;  %v641_v43 = vmul.f32 1.442695, %v467_v28 }
  0xb0   : > { %v1335_v37 = vpop.eup %1334  ;;  %843 = vmatprep.subr.mxu0 %v1333_v33  ;;  %1360 = vpow2.f32 %v661_v22  ;;  %v326_v33 = vld [vmem:[%s1790_s7 + $0x160] sm:$0xff]  ;;  %v530_v40 = vmul.f32 %v1815_v11, %v391_v29  ;;  %v769_v47 = vmul.f32 1.442695, %v531_v32 }
  0xb1   : > { %v1337_v41 = vpop.eup %1336  ;;  %914 = vmatprep.subr.mxu1 %v1335_v37  ;;  %1362 = vpow2.f32 %v789_v26  ;;  %v390_v37 = vld [vmem:[%s1790_s7 + $0x360] sm:$0xff]  ;;  %v465_v44 = vmul.f32 %v1811_v10, %v326_v33  ;;  %v639_v51 = vmul.f32 1.442695, %v466_v36 }
  0xb2   : > { %v1339_v45 = vpop.eup %1338  ;;  %844 = vmatpush2.msra.mxu0 %v1337_v41  ;;  %1364 = vpow2.f32 %v659_v30  ;;  %v325_v41 = vld [vmem:[%s1790_s7 + $0x158] sm:$0xff]  ;;  %v529_v48 = vmul.f32 %v1811_v10, %v390_v37  ;;  %v767_v55 = vmul.f32 1.442695, %v530_v40 }
  0xb3   : > { %v1341_v49 = vpop.eup %1340  ;;  %915 = vmatpush2.msra.mxu1 %v1339_v45  ;;  %1366 = vpow2.f32 %v787_v34  ;;  %v389_v45 = vld [vmem:[%s1790_s7 + $0x358] sm:$0xff]  ;;  %v464_v52 = vmul.f32 %v1815_v11, %v325_v41  ;;  %v637_v59 = vmul.f32 1.442695, %v465_v44 }
  0xb4   : > { %v1343_v53 = vpop.eup %1342  ;;  %845 = vmatprep.subr.mxu0 %v1341_v49  ;;  %1368 = vpow2.f32 %v657_v38  ;;  %v324_v49 = vld [vmem:[%s1790_s7 + $0x150] sm:$0xff]  ;;  %v528_v56 = vmul.f32 %v1815_v11, %v389_v45  ;;  %v765_v63 = vmul.f32 1.442695, %v529_v48 }
  0xb5   : > { %v1345_v57 = vpop.eup %1344  ;;  %916 = vmatprep.subr.mxu1 %v1343_v53  ;;  %1370 = vpow2.f32 %v785_v42  ;;  %v388_v53 = vld [vmem:[%s1790_s7 + $0x350] sm:$0xff]  ;;  %v463_v60 = vmul.f32 %v1811_v10, %v324_v49  ;;  %v635_v4 = vmul.f32 1.442695, %v464_v52 }
  0xb6   : > { %v1347_v61 = vpop.eup %1346  ;;  %846 = vmatpush2.msra.mxu0 %v1345_v57  ;;  %1372 = vpow2.f32 %v655_v46  ;;  %v323_v57 = vld [vmem:[%s1790_s7 + $0x148] sm:$0xff]  ;;  %v527_v0 = vmul.f32 %v1811_v10, %v388_v53  ;;  %v763_v12 = vmul.f32 1.442695, %v528_v56 }
  0xb7   : > { %v1349_v1 = vpop.eup %1348  ;;  %917 = vmatpush2.msra.mxu1 %v1347_v61  ;;  %1374 = vpow2.f32 %v783_v50  ;;  %v387_v61 = vld [vmem:[%s1790_s7 + $0x348] sm:$0xff]  ;;  %v462_v7 = vmul.f32 %v1815_v11, %v323_v57  ;;  %v633_v16 = vmul.f32 1.442695, %v463_v60 }
  0xb8   : > { %v1351_v8 = vpop.eup %1350  ;;  %847 = vmatprep.subr.mxu0 %v1349_v1  ;;  %1376 = vpow2.f32 %v653_v54  ;;  %v322_v1 = vld [vmem:[%s1790_s7 + $0x140] sm:$0xff]  ;;  %v526_v13 = vmul.f32 %v1815_v11, %v387_v61  ;;  %v761_v20 = vmul.f32 1.442695, %v527_v0 }
  0xb9   : > { %v1353_v14 = vpop.eup %1352  ;;  %918 = vmatprep.subr.mxu1 %v1351_v8  ;;  %1378 = vpow2.f32 %v781_v58  ;;  %v386_v8 = vld [vmem:[%s1790_s7 + $0x340] sm:$0xff]  ;;  %v461_v17 = vmul.f32 %v1811_v10, %v322_v1  ;;  %v631_v24 = vmul.f32 1.442695, %v462_v7 }
  0xba   : > { %v1355_v18 = vpop.eup %1354  ;;  %848 = vmatpush2.msra.mxu0 %v1353_v14  ;;  %1380 = vpow2.f32 %v651_v62  ;;  %v321_v14 = vld [vmem:[%s1790_s7 + $0x138] sm:$0xff]  ;;  %v525_v21 = vmul.f32 %v1811_v10, %v386_v8  ;;  %v759_v28 = vmul.f32 1.442695, %v526_v13 }
  0xbb   : > { %v1357_v22 = vpop.eup %1356  ;;  %919 = vmatpush2.msra.mxu1 %v1355_v18  ;;  %1382 = vpow2.f32 %v779_v3  ;;  %v385_v18 = vld [vmem:[%s1790_s7 + $0x338] sm:$0xff]  ;;  %v460_v25 = vmul.f32 %v1815_v11, %v321_v14  ;;  %v629_v32 = vmul.f32 1.442695, %v461_v17 }
  0xbc   : > { %v1359_v26 = vpop.eup %1358  ;;  %849 = vmatprep.subr.mxu0 %v1357_v22  ;;  %1384 = vpow2.f32 %v649_v9  ;;  %v320_v22 = vld [vmem:[%s1790_s7 + $0x130] sm:$0xff]  ;;  %v524_v29 = vmul.f32 %v1815_v11, %v385_v18  ;;  %v757_v36 = vmul.f32 1.442695, %v525_v21 }
  0xbd   : > { %v1361_v30 = vpop.eup %1360  ;;  %920 = vmatprep.subr.mxu1 %v1359_v26  ;;  %1386 = vpow2.f32 %v777_v15  ;;  %v384_v26 = vld [vmem:[%s1790_s7 + $0x330] sm:$0xff]  ;;  %v459_v33 = vmul.f32 %v1811_v10, %v320_v22  ;;  %v627_v40 = vmul.f32 1.442695, %v460_v25 }
  0xbe   : > { %v1363_v34 = vpop.eup %1362  ;;  %850 = vmatpush2.msra.mxu0 %v1361_v30  ;;  %1388 = vpow2.f32 %v647_v19  ;;  %v319_v30 = vld [vmem:[%s1790_s7 + $0x128] sm:$0xff]  ;;  %v523_v37 = vmul.f32 %v1811_v10, %v384_v26  ;;  %v755_v44 = vmul.f32 1.442695, %v524_v29 }
  0xbf   : > { %v1365_v38 = vpop.eup %1364  ;;  %921 = vmatpush2.msra.mxu1 %v1363_v34  ;;  %1390 = vpow2.f32 %v775_v23  ;;  %v383_v34 = vld [vmem:[%s1790_s7 + $0x328] sm:$0xff]  ;;  %v458_v41 = vmul.f32 %v1815_v11, %v319_v30  ;;  %v625_v48 = vmul.f32 1.442695, %v459_v33 }
  0xc0   : > { %v1367_v42 = vpop.eup %1366  ;;  %851 = vmatprep.subr.mxu0 %v1365_v38  ;;  %1392 = vpow2.f32 %v645_v27  ;;  %v318_v38 = vld [vmem:[%s1790_s7 + $0x120] sm:$0xff]  ;;  %v522_v45 = vmul.f32 %v1815_v11, %v383_v34  ;;  %v753_v52 = vmul.f32 1.442695, %v523_v37 }
  0xc1   : > { %v1369_v46 = vpop.eup %1368  ;;  %922 = vmatprep.subr.mxu1 %v1367_v42  ;;  %1394 = vpow2.f32 %v773_v31  ;;  %v382_v42 = vld [vmem:[%s1790_s7 + $0x320] sm:$0xff]  ;;  %v457_v49 = vmul.f32 %v1811_v10, %v318_v38  ;;  %v623_v56 = vmul.f32 1.442695, %v458_v41 }
  0xc2   : > { %v1371_v50 = vpop.eup %1370  ;;  %852 = vmatpush2.msra.mxu0 %v1369_v46  ;;  %1396 = vpow2.f32 %v643_v35  ;;  %v317_v46 = vld [vmem:[%s1790_s7 + $0x118] sm:$0xff]  ;;  %v521_v53 = vmul.f32 %v1811_v10, %v382_v42  ;;  %v751_v60 = vmul.f32 1.442695, %v522_v45 }
  0xc3   : > { %v1373_v54 = vpop.eup %1372  ;;  %923 = vmatpush2.msra.mxu1 %v1371_v50  ;;  %1398 = vpow2.f32 %v771_v39  ;;  %v381_v50 = vld [vmem:[%s1790_s7 + $0x318] sm:$0xff]  ;;  %v456_v57 = vmul.f32 %v1815_v11, %v317_v46  ;;  %v621_v0 = vmul.f32 1.442695, %v457_v49  ;;  %v807_v46 = vld [vmem:[%s1783_s4] sm:$0xff] }
  0xc4   : > { %v1375_v58 = vpop.eup %1374  ;;  %853 = vmatprep.subr.mxu0 %v1373_v54  ;;  %1400 = vpow2.f32 %v641_v43  ;;  %v316_v54 = vld [vmem:[%s1790_s7 + $0x110] sm:$0xff]  ;;  %v520_v61 = vmul.f32 %v1815_v11, %v381_v50  ;;  %v749_v7 = vmul.f32 1.442695, %v521_v53 }
  0xc5   : > { %v1377_v62 = vpop.eup %1376  ;;  %924 = vmatprep.subr.mxu1 %v1375_v58  ;;  %1402 = vpow2.f32 %v769_v47  ;;  %v380_v58 = vld [vmem:[%s1790_s7 + $0x310] sm:$0xff]  ;;  %v455_v1 = vmul.f32 %v1811_v10, %v316_v54  ;;  %v619_v13 = vmul.f32 1.442695, %v456_v57 }
  0xc6   : > { %v1379_v3 = vpop.eup %1378  ;;  %854 = vmatpush2.msra.mxu0 %v1377_v62  ;;  %1404 = vpow2.f32 %v639_v51  ;;  %v315_v62 = vld [vmem:[%s1790_s7 + $0x108] sm:$0xff]  ;;  %v519_v8 = vmul.f32 %v1811_v10, %v380_v58  ;;  %v747_v17 = vmul.f32 1.442695, %v520_v61 }
  0xc7   : > { %v1381_v9 = vpop.eup %1380  ;;  %925 = vmatpush2.msra.mxu1 %v1379_v3  ;;  %1406 = vpow2.f32 %v767_v55  ;;  %v379_v3 = vld [vmem:[%s1790_s7 + $0x308] sm:$0xff]  ;;  %v454_v14 = vmul.f32 %v1815_v11, %v315_v62 }
  0xc8   : > { %v1383_v15 = vpop.eup %1382  ;;  %855 = vmatprep.subr.mxu0 %v1381_v9  ;;  %1408 = vpow2.f32 %v637_v59  ;;  %v314_v9 = vld [vmem:[%s1790_s7 + $0x100] sm:$0xff]  ;;  %v518_v18 = vmul.f32 %v1815_v11, %v379_v3 }
  0xc9   : > { %v1385_v19 = vpop.eup %1384  ;;  %926 = vmatprep.subr.mxu1 %v1383_v15  ;;  %1410 = vpow2.f32 %v765_v63  ;;  %v378_v15 = vld [vmem:[%s1790_s7 + $0x300] sm:$0xff]  ;;  %v453_v21 = vmul.f32 %v1811_v10, %v314_v9  ;;  %v615_v26 = vmul.f32 1.442695, %v454_v14 }
  0xca   : > { %v1387_v23 = vpop.eup %1386  ;;  %856 = vmatpush2.msra.mxu0 %v1385_v19  ;;  %1412 = vpow2.f32 %v635_v4  ;;  %v743_v11 = vmul.f32 1.442695, %v518_v18 }
  0xcb   : > { %v1389_v27 = vpop.eup %1388  ;;  %927 = vmatpush2.msra.mxu1 %v1387_v23  ;;  %1414 = vpow2.f32 %v763_v12  ;;  %v745_v23 = vmul.f32 1.442695, %v519_v8  ;;  %v613_v29 = vmul.f32 1.442695, %v453_v21 }
  0xcc   : > { %v1391_v31 = vpop.eup %1390  ;;  %857 = vmatprep.subr.mxu0 %v1389_v27  ;;  %1416 = vpow2.f32 %v633_v16 }
  0xcd   : > { %v1393_v35 = vpop.eup %1392  ;;  %928 = vmatprep.subr.mxu1 %v1391_v31  ;;  %1418 = vpow2.f32 %v761_v20  ;;  %v617_v20 = vmul.f32 1.442695, %v455_v1 }
  0xce   : > { %v1395_v39 = vpop.eup %1394  ;;  %858 = vmatpush2.msra.mxu0 %v1393_v35  ;;  %1420 = vpow2.f32 %v631_v24  ;;  %v517_v24 = vmul.f32 %v1811_v10, %v378_v15 }
  0xcf   : > { %v1397_v43 = vpop.eup %1396  ;;  %929 = vmatpush2.msra.mxu1 %v1395_v39  ;;  %1422 = vpow2.f32 %v759_v28 }
  0xd0   : > { %v1399_v47 = vpop.eup %1398  ;;  %859 = vmatprep.subr.mxu0 %v1397_v43  ;;  %1424 = vpow2.f32 %v629_v32  ;;  %v741_v31 = vmul.f32 1.442695, %v517_v24 }
  0xd1   : > { %v1401_v51 = vpop.eup %1400  ;;  %930 = vmatprep.subr.mxu1 %v1399_v47  ;;  %1426 = vpow2.f32 %v757_v36 }
  0xd2   : > { %v1403_v55 = vpop.eup %1402  ;;  %860 = vmatpush2.msra.mxu0 %v1401_v51  ;;  %1428 = vpow2.f32 %v627_v40  ;;  %v805_v51 = vld [vmem:[#allocation2] sm:$0xff] }
  0xd3   : > { %v1405_v59 = vpop.eup %1404  ;;  %931 = vmatpush2.msra.mxu1 %v1403_v55  ;;  %1430 = vpow2.f32 %v755_v44  ;;  %v806_v55 = vld [vmem:[#allocation2 + $0x8] sm:$0xff] }
  0xd4   : > { %v1407_v63 = vpop.eup %1406  ;;  %861 = vmatprep.subr.mxu0 %v1405_v59  ;;  %1432 = vpow2.f32 %v625_v48  ;;  %v809_v48 = vld [vmem:[%s1783_s4 + $0x10] sm:$0xff] }
  0xd5   : > { %v1409_v4 = vpop.eup %1408  ;;  %932 = vmatprep.subr.mxu1 %v1407_v63  ;;  %1434 = vpow2.f32 %v753_v52 }
  0xd6   : > { %v1411_v12 = vpop.eup %1410  ;;  %862 = vmatpush2.msra.mxu0 %v1409_v4  ;;  %1436 = vpow2.f32 %v623_v56 }
  0xd7   : > { %v1413_v16 = vpop.eup %1412  ;;  %933 = vmatpush2.msra.mxu1 %v1411_v12  ;;  %1438 = vpow2.f32 %v751_v60 }
  0xd8   : > { %v1415_v19 = vpop.eup %1414  ;;  %863 = vmatprep.subr.mxu0 %v1413_v16  ;;  %1440 = vpow2.f32 %v621_v0 }
  0xd9   : > { %v1417_v22 = vpop.eup %1416  ;;  %934 = vmatprep.subr.mxu1 %v1415_v19  ;;  %1442 = vpow2.f32 %v749_v7 }
  0xda   : > { %v1419_v25 = vpop.eup %1418  ;;  %864 = vmatpush2.msra.mxu0 %v1417_v22  ;;  %1444 = vpow2.f32 %v619_v13 }
  0xdb   : > { %v1421_v27 = vpop.eup %1420  ;;  %935 = vmatpush2.msra.mxu1 %v1419_v25  ;;  %1446 = vpow2.f32 %v747_v17 }
  0xdc   : > { %v1423_v28 = vpop.eup %1422  ;;  %865 = vmatprep.subr.mxu0 %v1421_v27  ;;  %1448 = vpow2.f32 %v617_v20 }
  0xdd   : > { %v1425_v30 = vpop.eup %1424  ;;  %936 = vmatprep.subr.mxu1 %v1423_v28  ;;  %1450 = vpow2.f32 %v745_v23 }
  0xde   : > { %v1427_v32 = vpop.eup %1426  ;;  %866 = vmatpush2.msra.mxu0 %v1425_v30  ;;  %1452 = vpow2.f32 %v615_v26 }
  0xdf   : > { %v1429_v10 = vpop.eup %1428  ;;  %937 = vmatpush2.msra.mxu1 %v1427_v32  ;;  %1454 = vpow2.f32 %v743_v11 }
  0xe0   : > { %v1431_v33 = vpop.eup %1430  ;;  %867 = vmatprep.subr.mxu0 %v1429_v10  ;;  %1456 = vpow2.f32 %v613_v29 }
  0xe1   : > { %v1433_v34 = vpop.eup %1432  ;;  %938 = vmatprep.subr.mxu1 %v1431_v33  ;;  %1458 = vpow2.f32 %v741_v31 }
  0xe2   : > { %v1435_v35 = vpop.eup %1434  ;;  %868 = vmatpush2.msra.mxu0 %v1433_v34 }
  0xe3   : > { %v1437_v36 = vpop.eup %1436  ;;  %939 = vmatpush2.msra.mxu1 %v1435_v35 }
  0xe4   : > { %v1439_v37 = vpop.eup %1438  ;;  %869 = vmatprep.subr.mxu0 %v1437_v36 }
  0xe5   : > { %v1441_v38 = vpop.eup %1440  ;;  %940 = vmatprep.subr.mxu1 %v1439_v37 }
  0xe6   : > { %v1443_v39 = vpop.eup %1442  ;;  %870 = vmatpush2.msra.mxu0 %v1441_v38 }
  0xe7   : > { %v1445_v40 = vpop.eup %1444  ;;  %941 = vmatpush2.msra.mxu1 %v1443_v39 }
  0xe8   : > { %v1447_v41 = vpop.eup %1446  ;;  %871 = vmatprep.subr.mxu0 %v1445_v40 }
  0xe9   : > { %v1449_v42 = vpop.eup %1448  ;;  %942 = vmatprep.subr.mxu1 %v1447_v41 }
  0xea   : > { %v1451_v43 = vpop.eup %1450  ;;  %872 = vmatpush2.msra.mxu0 %v1449_v42 }
  0xeb   : > { %v1453_v44 = vpop.eup %1452  ;;  %943 = vmatpush2.msra.mxu1 %v1451_v43 }
  0xec   : > { %v1455_v45 = vpop.eup %1454  ;;  %873 = vmatprep.subr.mxu0 %v1453_v44 }
  0xed   : > { %v1457_v47 = vpop.eup %1456  ;;  %944 = vmatprep.subr.mxu1 %v1455_v45 }
  0xee   : > { %v1459_v49 = vpop.eup %1458  ;;  %874 = vmatpush2.msra.mxu0 %v1457_v47 }
  0xef   : > { %945 = vmatpush2.msra.mxu1 %v1459_v49  ;;  %876 = vmatmul.mubr.f32.vlgmr.msra.gmra.mxu0 %v807_v46 }
  0xf0   : > { %947 = vmatmul.mubr.f32.vlgmr.msra.gmra.mxu1 %v809_v48 }
 0x1af   : > { %v877_v50 = vpop.f32.mrf.mxu0 }
 0x1b0   : > { %v948_v52 = vpop.f32.mrf.mxu1 }
 0x1b1   : > { %v949_v53 = vadd.f32 %v948_v52, %v877_v50  ;;  %v879_v54 = vpop.f32.mrf.mxu0 }
 0x1b2   : > { %v950_v56 = vpop.f32.mrf.mxu1 }
 0x1b3   : > { %v953_v57 = vadd.f32 %v949_v53, %v805_v51  ;;  %v951_v58 = vadd.f32 %v950_v56, %v879_v54  ;;  %960 = sbr.rel (%p1115_p12) target bundleno = 450 (0x1c2), region = 52 }
 0x1b5   : > { %955 = vst [vmem:[#allocation2] sm:$0xff] %v953_v57  ;;  %v954_v59 = vadd.f32 %v951_v58, %v806_v55 }
 0x1b7   : > { %956 = vst [vmem:[#allocation2 + $0x8] sm:$0xff] %v954_v59 }
 0x1b8   : > { %v962_v60 = vld [vmem:[#allocation8 + $0x1] ss:$2 sm:$0x3] }
 0x1b9   : > { %v969_v63 = vrot.slane %v962_v60, %v413_v5  ;;  %v973_v0 = vrot.slane %v962_v60, %v417_v6 }
 0x1bc   : > { %v963_v61 = vld [vmem:[#allocation2] sm:$0xff] }
 0x1bd   : > { %v976_v1 = vmul.f32 %v969_v63, %v963_v61 }
 0x1be   : > { %v964_v62 = vld [vmem:[#allocation2 + $0x8] sm:$0xff] }
 0x1bf   : > { %v977_v3 = vmul.f32 %v973_v0, %v964_v62  ;;  %978 = vst [vmem:[#allocation9] sm:$0xff] %v976_v1 }
 0x1c1   : > { %979 = vst [vmem:[#allocation9 + $0x8] sm:$0xff] %v977_v3 }
 0x1c2 PF: > { %p1149_p13 = scmp.eq.s32.totalorder %s1686_s18, 1  ;;  %s1636_s20 = smov [#allocation9]  }
 0x1c3   : > { %s992_s15 = sshll.u32 %s1636_s20, 4  ;;  %s993_s15 = int_to_ptr.vmem [resolvable:$true] %s992_s15 }
 0x1c4   : > { %s1542_s21 = scalar_lea.vmem %s993_s15, 256  ;;  %p1549_p7 = scmp.lt.s32.totalorder %s993_s15, %s993_s15 }
 0x1c5   : > { %p1543_p1 = scmp.ne.s32.totalorder %s993_s15, %s1542_s21  ;;  %p1550_p0 = scmp.lt.s32.totalorder %s1542_s21, %s1542_s21 }
 0x1c7   : > { %p1544_p3 = pnand %p1543_p1, %p1149_p13  ;;  %p1551_p6 = por %p1550_p0, %p1549_p7 }
 0x1c9   : > { %p1545_p4 = pneg %p1544_p3 }
 0x1cb   : > { %p1552_p8 = pnand %p1551_p6, %p1545_p4 }
 0x1cd   : > { %1555 = shalt.err (!%p1552_p8)
}
 0x1ce   : > { %1132 = dma.vmem_to_hbm [thread:$0]  (%p1149_p13), %s993_s15, 256, %s2111_s3, [#allocation5]  }
 0x1cf   : > { %1603 = dma.done.wait (%p1149_p13), [#allocation5], 256  }
 0x1d0   : > { %1605 = vsyncadd (%p1149_p13), [#allocation5], 4294967040 }
 0x1d1 PF: > { %s20_s17 = sadd.s32 1, %s1628_s17   ;;  %s2125_s12 = smov %s1612_s13 }
 0x1d2   : > { %p17_p9 = scmp.ge.s32.totalorder %s20_s17, 4   ;;  %s2126_s13 = smov %s1616_s14 }
 0x1d3   : > { %s2127_s14 = smov %s1751_s11  ;;  %s2128_s15 = smov %s1624_s16 }
 0x1d4   : > { %s2129_s16 = smov %s2131_s25  ;;  %19 = sbr.rel (!%p17_p9) target bundleno = 7 (0x7), region = 97 }
 0x1d9   :  { %1005 = vsyncpa [#allocation4], 1 }
 0x1da   :  { %1007 = vsyncpa [#allocation4 + $0x1], 1 }
 0x1db   :  { %1008 = vsyncpa [#allocation7], 1 }
 0x1dc   :  { %1010 = vsyncpa [#allocation7 + $0x1], 1 }
 0x1dd   :  { %1011 = vsyncpa [#allocation5], 1 }
 0x1de   :  { %1013 = vsyncpa [#allocation5 + $0x1], 1 }

</bundles_post_ra>
